<compile_context>
chip_gen: v5e
topology: v5e:2x2
jax: 0.10.0
libtpu: 0.0.40
codegen_flags: <defaults>
</compile_context>

<pallas_src>
import jax
import jax.numpy as jnp
from jax.experimental import pallas as pl
from jax.experimental.pallas import tpu as pltpu

_MAX_BATCH_TILE = 4096   # lanes per grid step; lane-padded fp32 intermediates stay << 32 MiB
_SINGLE_TILE_MAX = 256   # below this, one full-batch tile (no 128-lane alignment needed)


def _round_up(x, m):
    return ((x + m - 1) // m) * m


def _choose_batch_tile(batch):
    if batch <= _SINGLE_TILE_MAX:
        return batch  # single tile == full array dim (satisfies BlockSpec constraint)
    # >= 2 lane-aligned grid steps so dimension_semantics=("parallel",) can shard the
    # batch across the two TensorCores on v7x (harmless on single-TC v5e/v6e).
    return min(_MAX_BATCH_TILE, _round_up(-(-batch // 2), 128))


def critic_twin_kernel(sa_ref, w1_ref, b1_ref, w2_ref, b2_ref, wq_ref, bq_ref, out_ref):
    # Batch-on-lanes layout: every matmul result has N = tb on the lane axis.
    # bf16 MXU operands, fp32 accumulation, fp32 bias/ReLU epilogue (no bf16 VALU on v5e).
    sa = sa_ref[...]                                                     # (S+A, tb) bf16
    h = jnp.dot(w1_ref[...], sa, preferred_element_type=jnp.float32) + b1_ref[...]
    h = jnp.maximum(h, 0.0)                                              # enc_sa ReLU
    h = jnp.dot(w2_ref[...], h.astype(jnp.bfloat16),
                preferred_element_type=jnp.float32) + b2_ref[...]        # (d1, tb)
    # dec_q1 | dec_q2 fused along the sublane axis; value_re_norm folded into wq/bq.
    out_ref[...] = jnp.dot(wq_ref[...], h.astype(jnp.bfloat16),
                           preferred_element_type=jnp.float32) + bq_ref[...]


def _critic_twin_pallas(state, action, prep):
    batch = state.shape[0]
    # One fused wrapper pass: concat -> transpose -> bf16 cast (XLA fuses these).
    sa_t = jnp.concatenate([state, action], axis=1).T.astype(jnp.bfloat16)  # (S+A, batch)
    in_feat = sa_t.shape[0]
    d0 = prep["w1_t"].shape[0]
    d1 = prep["w2_t"].shape[0]
    out_dim = prep["wq_t"].shape[0]          # = 2 * action_dim (twin heads fused)

    tb = _choose_batch_tile(batch)
    nb = pl.cdiv(batch, tb)                  # ragged last tile handled by Pallas (no pad)

    stream_spec = pl.BlockSpec((in_feat, tb), lambda i: (0, i))

    def resident(arr):
        # Constant block index -> weight/bias stays resident in VMEM across grid steps.
        return pl.BlockSpec(arr.shape, lambda i: (0, 0))

    weight_bytes = sum(int(prep[k].size) * prep[k].dtype.itemsize
                       for k in ("w1_t", "b1_t", "w2_t", "b2_t", "wq_t", "bq_t"))
    flops = 2 * batch * (in_feat * d0 + d0 * d1 + d1 * out_dim)
    bytes_accessed = batch * in_feat * 2 + batch * out_dim * 4 + weight_bytes

    q_t = pl.pallas_call(
        critic_twin_kernel,
        out_shape=jax.ShapeDtypeStruct((out_dim, batch), jnp.float32),
        grid=(nb,),
        in_specs=[
            stream_spec,
            resident(prep["w1_t"]), resident(prep["b1_t"]),
            resident(prep["w2_t"]), resident(prep["b2_t"]),
            resident(prep["wq_t"]), resident(prep["bq_t"]),
        ],
        out_specs=pl.BlockSpec((out_dim, tb), lambda i: (0, i)),
        compiler_params=pltpu.CompilerParams(
            dimension_semantics=("parallel",),
            vmem_limit_bytes=32 * 1024 * 1024),
        cost_estimate=pl.CostEstimate(
            flops=flops, transcendentals=0, bytes_accessed=bytes_accessed),
    )(sa_t, prep["w1_t"], prep["b1_t"], prep["w2_t"], prep["b2_t"],
      prep["wq_t"], prep["bq_t"])
    return q_t.T                               # (batch, 2*action_dim)


def critic_twin_get_q1_q2(state, action, prep):
    """Equivalent of CriticTwin.get_q1_q2 (one fused kernel launch)."""
    action_dim = prep["wq_t"].shape[0] // 2
    q = _critic_twin_pallas(state, action, prep)
    return q[:, :action_dim], q[:, action_dim:]


def critic_twin_forward(state, action, prep):
    """Equivalent of CriticTwin.forward (Q1 head only)."""
    return critic_twin_get_q1_q2(state, action, prep)[0]


def init_params(key, state_dim, action_dim, dims):
    """fp32 parameters mirroring the PyTorch module (weights stored as (in, out))."""
    k1, k2, k3, k4, kb1, kb2 = jax.random.split(key, 6)
    in0 = state_dim + action_dim

    def linear_default(kw, kb, fan_in, fan_out):
        # PyTorch nn.Linear default: U(-1/sqrt(fan_in), 1/sqrt(fan_in))
        bound = 1.0 / jnp.sqrt(jnp.float32(fan_in))
        w = jax.random.uniform(kw, (fan_in, fan_out), jnp.float32, -bound, bound)
        b = jax.random.uniform(kb, (1, fan_out), jnp.float32, -bound, bound)
        return w, b

    w1, b1 = linear_default(k1, kb1, in0, dims[0])
    w2, b2 = linear_default(k2, kb2, dims[0], dims[1])
    orth = jax.nn.initializers.orthogonal(scale=0.5)
    wq1 = orth(k3, (dims[-1], action_dim), jnp.float32)   # layer_init_with_orthogonal std=0.5
    wq2 = orth(k4, (dims[-1], action_dim), jnp.float32)
    bq1 = jnp.full((1, action_dim), 1e-6, jnp.float32)
    bq2 = jnp.full((1, action_dim), 1e-6, jnp.float32)
    return {
        "w1": w1, "b1": b1, "w2": w2, "b2": b2,
        "wq1": wq1, "bq1": bq1, "wq2": wq2, "bq2": bq2,
        # non-trainable normalization buffers (CriticBase.__init__)
        "state_avg": jnp.zeros((state_dim,), jnp.float32),
        "state_std": jnp.ones((state_dim,), jnp.float32),
        "value_avg": jnp.zeros((1,), jnp.float32),
        "value_std": jnp.ones((1,), jnp.float32),
    }


def pack_params(params, state_dim):
    """One-time offline prep: fold state-norm into layer 1, fold value-re-norm into the
    fused twin heads, transpose everything for the batch-on-lanes layout, cast matmul
    operands to bf16 (biases stay fp32)."""
    std = params["state_std"]
    # Guard: the original module would already produce inf/NaN if std had zeros.
    # NOTE: if state_std has a huge dynamic range, the bf16 cast of the folded W1 loses
    # more precision than the unfolded module; keep w1_t in fp32 in that case.
    std = jnp.where(std == 0.0, 1.0, std)
    inv_std = 1.0 / std
    w1 = params["w1"]                                              # (S+A, d0)
    # (state - avg)/std @ W1s  ==  state @ (W1s * inv_std[:,None]) - (avg*inv_std) @ W1s
    w1_folded = w1.at[:state_dim].multiply(inv_std[:, None])
    b1 = params["b1"] - (params["state_avg"] * inv_std) @ w1[:state_dim]   # (1, d0)
    # value_re_norm fold: q*vs + va == h @ (Wq*vs) + (bq*vs + va)
    v_std = params["value_std"][0]
    v_avg = params["value_avg"][0]
    wq = jnp.concatenate([params["wq1"], params["wq2"]], axis=1) * v_std   # (d1, 2A)
    bq = jnp.concatenate([params["bq1"], params["bq2"]], axis=1) * v_std + v_avg
    bf = jnp.bfloat16
    return {
        "w1_t": w1_folded.T.astype(bf),            # (d0, S+A)
        "b1_t": b1.T.astype(jnp.float32),          # (d0, 1)
        "w2_t": params["w2"].T.astype(bf),         # (d1, d0)
        "b2_t": params["b2"].T.astype(jnp.float32),
        "wq_t": wq.T.astype(bf),                   # (2A, d1)
        "bq_t": bq.T.astype(jnp.float32),          # (2A, 1)
    }


def ref_forward_bf16(state, action, prep):
    """Pure-JAX replica of the exact kernel math (bf16 operands, fp32 accumulation)."""
    bf = jnp.bfloat16
    sa_t = jnp.concatenate([state, action], axis=1).T.astype(bf)
    h = jnp.dot(prep["w1_t"], sa_t, preferred_element_type=jnp.float32) + prep["b1_t"]
    h = jnp.maximum(h, 0.0)
    h = jnp.dot(prep["w2_t"], h.astype(bf), preferred_element_type=jnp.float32) + prep["b2_t"]
    q = jnp.dot(prep["wq_t"], h.astype(bf), preferred_element_type=jnp.float32) + prep["bq_t"]
    return q.T


def ref_forward_fp32(state, action, params):
    """fp32 reference of the original PyTorch module math (unfolded parameters)."""
    s = (state - params["state_avg"]) / params["state_std"]
    sa = jnp.concatenate([s, action], axis=1)
    h = jnp.maximum(sa @ params["w1"] + params["b1"], 0.0)
    h = h @ params["w2"] + params["b2"]
    q1 = (h @ params["wq1"] + params["bq1"]) * params["value_std"] + params["value_avg"]
    q2 = (h @ params["wq2"] + params["bq2"]) * params["value_std"] + params["value_avg"]
    return q1, q2


if __name__ == "__main__":
    batch, state_dim, action_dim = 2, 8, 4
    dims = [32, 32]

    key = jax.random.PRNGKey(0)
    k_state, k_action, k_params = jax.random.split(key, 3)

    state = jax.random.normal(k_state, (batch, state_dim), jnp.float32)
    action = jax.random.normal(k_action, (batch, action_dim), jnp.float32)

    params = init_params(k_params, state_dim, action_dim, dims)
    # Non-trivial normalization buffers so the W1/b1 and Wq/bq folds are exercised.
    params["state_avg"] = 0.1 * jnp.arange(state_dim, dtype=jnp.float32)
    params["state_std"] = jnp.linspace(0.5, 1.5, state_dim, dtype=jnp.float32)
    params["value_avg"] = jnp.array([0.25], jnp.float32)
    params["value_std"] = jnp.array([2.0], jnp.float32)

    prep = pack_params(params, state_dim)

    q1_fwd = critic_twin_forward(state, action, prep)        # == module.forward
    q1, q2 = critic_twin_get_q1_q2(state, action, prep)      # == module.get_q1_q2
    q1_fwd = jax.block_until_ready(q1_fwd)
    q1 = jax.block_until_ready(q1)
    q2 = jax.block_until_ready(q2)
    assert q1_fwd.shape == (batch, action_dim)
    assert q1.shape == (batch, action_dim) and q2.shape == (batch, action_dim)
    assert jnp.allclose(q1_fwd, q1, atol=1e-6)

    # Tight check: pure-JAX replica of the same bf16/fp32 math.
    ref = ref_forward_bf16(state, action, prep)
    assert jnp.allclose(q1, ref[:, :action_dim], atol=1e-3, rtol=1e-3)
    assert jnp.allclose(q2, ref[:, action_dim:], atol=1e-3, rtol=1e-3)

    # Loose check: fp32 original-module math (tolerance covers bf16 weight/activation rounding).
    r1, r2 = ref_forward_fp32(state, action, params)
    assert jnp.allclose(q1, r1, atol=5e-2, rtol=5e-2)
    assert jnp.allclose(q2, r2, atol=5e-2, rtol=5e-2)

    print("KERNEL_OK")
</pallas_src>

<mosaic_0001>
module attributes {stable_mosaic.version = 11 : i64} {
  func.func @critic_twin_kernel(%arg0: i32, %arg1: memref<12x2xbf16, #tpu.memory_space<vmem>>, %arg2: memref<32x12xbf16, #tpu.memory_space<vmem>>, %arg3: memref<32x1xf32, #tpu.memory_space<vmem>>, %arg4: memref<32x32xbf16, #tpu.memory_space<vmem>>, %arg5: memref<32x1xf32, #tpu.memory_space<vmem>>, %arg6: memref<8x32xbf16, #tpu.memory_space<vmem>>, %arg7: memref<8x1xf32, #tpu.memory_space<vmem>>, %arg8: memref<8x2xf32, #tpu.memory_space<vmem>>) attributes {dimension_semantics = [#tpu.dimension_semantics<parallel>], iteration_bounds = array<i64: 1>, scalar_prefetch = 0 : i64, scratch_operands = 0 : i64, tpu.core_type = #tpu.core_type<tc>, window_params = [{transform_indices = @transform_0, window_bounds = array<i64: 12, 2>}, {pipeline_mode = #tpu.pipeline_mode<synchronous>, transform_indices = @transform_1, window_bounds = array<i64: 32, 12>}, {pipeline_mode = #tpu.pipeline_mode<synchronous>, transform_indices = @transform_2, window_bounds = array<i64: 32, 1>}, {pipeline_mode = #tpu.pipeline_mode<synchronous>, transform_indices = @transform_3, window_bounds = array<i64: 32, 32>}, {pipeline_mode = #tpu.pipeline_mode<synchronous>, transform_indices = @transform_4, window_bounds = array<i64: 32, 1>}, {pipeline_mode = #tpu.pipeline_mode<synchronous>, transform_indices = @transform_5, window_bounds = array<i64: 8, 32>}, {pipeline_mode = #tpu.pipeline_mode<synchronous>, transform_indices = @transform_6, window_bounds = array<i64: 8, 1>}, {transform_indices = @transform_7, window_bounds = array<i64: 8, 2>}]} {
    %c0 = arith.constant 0 : index
    %c0_0 = arith.constant 0 : index
    %0 = vector.load %arg1[%c0, %c0_0] : memref<12x2xbf16, #tpu.memory_space<vmem>>, vector<12x2xbf16>
    %c0_1 = arith.constant 0 : index
    %c0_2 = arith.constant 0 : index
    %1 = vector.load %arg2[%c0_1, %c0_2] : memref<32x12xbf16, #tpu.memory_space<vmem>>, vector<32x12xbf16>
    %cst = arith.constant dense<0.000000e+00> : vector<32x2xf32>
    %2 = tpu.matmul %1, %0, %cst {dimension_numbers = #tpu.dot_dimension_numbers<[1], [0], [0], [1], [0, 0, 1, 1], [], []>} : vector<32x12xbf16>, vector<12x2xbf16>, vector<32x2xf32> -> vector<32x2xf32>
    %c0_3 = arith.constant 0 : index
    %c0_4 = arith.constant 0 : index
    %3 = vector.load %arg3[%c0_3, %c0_4] : memref<32x1xf32, #tpu.memory_space<vmem>>, vector<32x1xf32>
    %4 = vector.broadcast %3 : vector<32x1xf32> to vector<32x2xf32>
    %5 = arith.addf %2, %4 : vector<32x2xf32>
    %cst_5 = arith.constant 0.000000e+00 : f32
    %6 = vector.broadcast %cst_5 : f32 to vector<32x2xf32>
    %7 = arith.maximumf %5, %6 : vector<32x2xf32>
    %c0_6 = arith.constant 0 : index
    %c0_7 = arith.constant 0 : index
    %8 = vector.load %arg4[%c0_6, %c0_7] : memref<32x32xbf16, #tpu.memory_space<vmem>>, vector<32x32xbf16>
    %9 = arith.truncf %7 : vector<32x2xf32> to vector<32x2xbf16>
    %cst_8 = arith.constant dense<0.000000e+00> : vector<32x2xf32>
    %10 = tpu.matmul %8, %9, %cst_8 {dimension_numbers = #tpu.dot_dimension_numbers<[1], [0], [0], [1], [0, 0, 1, 1], [], []>} : vector<32x32xbf16>, vector<32x2xbf16>, vector<32x2xf32> -> vector<32x2xf32>
    %c0_9 = arith.constant 0 : index
    %c0_10 = arith.constant 0 : index
    %11 = vector.load %arg5[%c0_9, %c0_10] : memref<32x1xf32, #tpu.memory_space<vmem>>, vector<32x1xf32>
    %12 = vector.broadcast %11 : vector<32x1xf32> to vector<32x2xf32>
    %13 = arith.addf %10, %12 : vector<32x2xf32>
    %c0_11 = arith.constant 0 : index
    %c0_12 = arith.constant 0 : index
    %14 = vector.load %arg6[%c0_11, %c0_12] : memref<8x32xbf16, #tpu.memory_space<vmem>>, vector<8x32xbf16>
    %15 = arith.truncf %13 : vector<32x2xf32> to vector<32x2xbf16>
    %cst_13 = arith.constant dense<0.000000e+00> : vector<8x2xf32>
    %16 = tpu.matmul %14, %15, %cst_13 {dimension_numbers = #tpu.dot_dimension_numbers<[1], [0], [0], [1], [0, 0, 1, 1], [], []>} : vector<8x32xbf16>, vector<32x2xbf16>, vector<8x2xf32> -> vector<8x2xf32>
    %c0_14 = arith.constant 0 : index
    %c0_15 = arith.constant 0 : index
    %17 = vector.load %arg7[%c0_14, %c0_15] : memref<8x1xf32, #tpu.memory_space<vmem>>, vector<8x1xf32>
    %18 = vector.broadcast %17 : vector<8x1xf32> to vector<8x2xf32>
    %19 = arith.addf %16, %18 : vector<8x2xf32>
    %c0_16 = arith.constant 0 : index
    %c0_17 = arith.constant 0 : index
    %20 = vector.load %arg8[%c0_16, %c0_17] : memref<8x2xf32, #tpu.memory_space<vmem>>, vector<8x2xf32>
    tpu.vector_store %arg8[%c0_16, %c0_17], %19 {strides = array<i32>} : memref<8x2xf32, #tpu.memory_space<vmem>>, vector<8x2xf32>,
    return
  }
  func.func @transform_0(%arg0: i32) -> (i32, i32) {
    %c0_i32 = arith.constant 0 : i32
    %c0_i32_0 = arith.constant 0 : i32
    return %c0_i32, %arg0 : i32, i32
  }
  func.func @transform_1(%arg0: i32) -> (i32, i32) {
    %c0_i32 = arith.constant 0 : i32
    %c0_i32_0 = arith.constant 0 : i32
    %c0_i32_1 = arith.constant 0 : i32
    return %c0_i32, %c0_i32_0 : i32, i32
  }
  func.func @transform_2(%arg0: i32) -> (i32, i32) {
    %c0_i32 = arith.constant 0 : i32
    %c0_i32_0 = arith.constant 0 : i32
    %c0_i32_1 = arith.constant 0 : i32
    return %c0_i32, %c0_i32_0 : i32, i32
  }
  func.func @transform_3(%arg0: i32) -> (i32, i32) {
    %c0_i32 = arith.constant 0 : i32
    %c0_i32_0 = arith.constant 0 : i32
    %c0_i32_1 = arith.constant 0 : i32
    return %c0_i32, %c0_i32_0 : i32, i32
  }
  func.func @transform_4(%arg0: i32) -> (i32, i32) {
    %c0_i32 = arith.constant 0 : i32
    %c0_i32_0 = arith.constant 0 : i32
    %c0_i32_1 = arith.constant 0 : i32
    return %c0_i32, %c0_i32_0 : i32, i32
  }
  func.func @transform_5(%arg0: i32) -> (i32, i32) {
    %c0_i32 = arith.constant 0 : i32
    %c0_i32_0 = arith.constant 0 : i32
    %c0_i32_1 = arith.constant 0 : i32
    return %c0_i32, %c0_i32_0 : i32, i32
  }
  func.func @transform_6(%arg0: i32) -> (i32, i32) {
    %c0_i32 = arith.constant 0 : i32
    %c0_i32_0 = arith.constant 0 : i32
    %c0_i32_1 = arith.constant 0 : i32
    return %c0_i32, %c0_i32_0 : i32, i32
  }
  func.func @transform_7(%arg0: i32) -> (i32, i32) {
    %c0_i32 = arith.constant 0 : i32
    %c0_i32_0 = arith.constant 0 : i32
    return %c0_i32, %arg0 : i32, i32
  }
}

</mosaic_0001>

<bundles_post_ra>
// kernel: tpu_custom_call.1
= control target key start
LH: loop header
LB: loop body
LE: loop exit
PB: predicated region body
PF: predicated region fallthrough
CT: control target
= control target key end

     0   :  { %vm79_vm0 = vcmask 1045504   ;;  %v239_v2 = vmov 0   ;;  %vm72_vm1 = vcmask 97280   ;;  %vm146_vm2 = vcmask 261120   ;;  %s334_s0 = inlined_call_operand.vmem [shape: bf16[12,2], index: 0, kind: input, shape index: {}]   ;;  %s335_s2 = inlined_call_operand.vmem [shape: f32[32,1], index: 2, kind: input, shape index: {}]   ;;  %s336_s1 = inlined_call_operand.vmem [shape: bf16[32,12], index: 1, kind: input, shape index: {}]   ;;  %s337_s4 = inlined_call_operand.vmem [shape: f32[32,1], index: 4, kind: input, shape index: {}]   ;;  %s338_s6 = inlined_call_operand.vmem [shape: f32[8,1], index: 6, kind: input, shape index: {}]   ;;  %s339_s3 = inlined_call_operand.vmem [shape: bf16[32,32], index: 3, kind: input, shape index: {}]   ;;  %s340_s5 = inlined_call_operand.vmem [shape: bf16[8,32], index: 5, kind: input, shape index: {}]   ;;  %s341_s7 = inlined_call_operand.vmem [shape: f32[8,2], index: 7, kind: output, shape index: {}]  }
   0x1   :  { %v213_v0 = vld [vmem:[%s334_s0] sm:$0xf]  ;;  %v228_v1 = vld [vmem:[%s334_s0] sm:$0x30]  ;;  %237 = vset.pattern.permute.xlu1 %v239_v2  ;;  %236 = vset.pattern.permute.xlu0 %v239_v2  ;;  %v35_v4 = vld [vmem:[%s335_s2 + $0x10] sm:$0xff]  ;;  %vm197_vm3 = vcmask 15360  }
   0x2   :  { %v214_v3 = vor.u32 %v228_v1, %v213_v0  ;;  %v33_v5 = vld [vmem:[%s335_s2] sm:$0xff]  ;;  %238 = vset.pattern.permute.xlu2 %v239_v2  ;;  %49 = vperm.xlu0 %236, %v35_v4   ;;  %v36_v8 = vld [vmem:[%s335_s2 + $0x18] sm:$0xff]  ;;  %v34_v9 = vld [vmem:[%s335_s2 + $0x8] sm:$0xff] }
   0x3   :  { %39 = vperm.xlu1 %237, %v33_v5   ;;  %v229_v7 = vld [vmem:[%s336_s1] sm:$0xff]  ;;  %v113_v11 = vld [vmem:[%s337_s4 + $0x8] sm:$0xff]  ;;  %v114_v14 = vld [vmem:[%s337_s4 + $0x10] sm:$0xff] }
   0x4   :  { %v81_v6 = vsel %vm79_vm0, %v214_v3, 0  ;;  %v112_v10 = vld [vmem:[%s337_s4] sm:$0xff]  ;;  %v230_v12 = vld [vmem:[%s336_s1 + $0x8] sm:$0xff]  ;;  %128 = vperm.xlu2 %238, %v114_v14   ;;  %v115_v17 = vld [vmem:[%s337_s4 + $0x18] sm:$0xff] }
   0x5   :  { %90 = vmatpush.bf16.msra.mxu0 %v81_v6  ;;  %v175_v20 = vld [vmem:[%s338_s6] sm:$0xff]  ;;  %v232_v35 = vld [vmem:[%s339_s3 + $0x8] sm:$0xff] }
   0x6   :  { %v231_v34 = vld [vmem:[%s339_s3] sm:$0xff] }
   0x7   :  { %v172_v50 = vld [vmem:[%s340_s5] sm:$0xf] }
   0x8   :  { %215 = vmatmul.msk.bf16.vlgmr.msra.gmra.mxu0 %vm72_vm1, %v229_v7 }
   0xa   :  { %54 = vperm.xlu0 %236, %v36_v8  }
   0xb   :  { %44 = vperm.xlu1 %237, %v34_v9  }
   0xc   :  { %133 = vperm.xlu2 %238, %v115_v17  }
  0x12   :  { %118 = vperm.xlu0 %236, %v112_v10  }
  0x13   :  { %123 = vperm.xlu1 %237, %v113_v11  }
  0x14   :  { %178 = vperm.xlu2 %238, %v175_v20  }
  0x18   :  { %216 = vmatmul.msk.bf16.gmra.mxu0 %vm72_vm1, %v230_v12 }
  0x5e   :  { %v129_v36 = vpop.permute.xlu2 %128 }
  0x66   :  { %v134_v39 = vpop.permute.xlu2 %133 }
  0x6e   :  { %v179_v51 = vpop.permute.xlu2 %178 }
  0x74   :  { %v50_v18 = vpop.permute.xlu0 %49 }
  0x75   :  { %v40_v16 = vpop.permute.xlu1 %39 }
  0x7c   :  { %v55_v23 = vpop.permute.xlu0 %54 }
  0x7d   :  { %v45_v21 = vpop.permute.xlu1 %44 }
  0x84   :  { %v119_v47 = vpop.permute.xlu0 %118 }
  0x85   :  { %v92_v13 = vpop.f32.mrf.mxu0  ;;  %v124_v44 = vpop.permute.xlu1 %123 }
  0x86   :  { %v93_v27 = vadd.f32 %v92_v13, %v40_v16 }
  0x88   :  { %v102_v32 = vmax.f32 %v93_v27, 0.0 }
  0x8d   :  { %v94_v15 = vpop.f32.mrf.mxu0 }
  0x8e   :  { %v95_v25 = vadd.f32 %v94_v15, %v45_v21 }
  0x90   :  { %v103_v30 = vmax.f32 %v95_v25, 0.0 }
  0x92   :  { %v110_v33 = vpack.c.bf16 %v103_v30, %v102_v32 }
  0x95   :  { %v97_v19 = vpop.f32.mrf.mxu0 }
  0x96   :  { %v98_v22 = vadd.f32 %v97_v19, %v50_v18 }
  0x98   :  { %v104_v28 = vmax.f32 %v98_v22, 0.0 }
  0x9d   :  { %v99_v24 = vpop.f32.mrf.mxu0 }
  0x9e   :  { %v100_v26 = vadd.f32 %v99_v24, %v55_v23 }
  0xa0   :  { %v105_v29 = vmax.f32 %v100_v26, 0.0 }
  0xa2   :  { %v111_v31 = vpack.c.bf16 %v105_v29, %v104_v28 }
  0xa4   :  { %159 = vmatpush.bf16.msra.mxu1 %v111_v31  ;;  %233 = vmatpush.bf16.msra.mxu3 %v111_v31 }
  0xa8   :  { %160 = vmatpush.bf16.msra.mxu1 %v110_v33  ;;  %234 = vmatpush.bf16.msra.mxu3 %v110_v33 }
  0xab   :  { %225 = vmatmul.msk.bf16.vlgmr.msra.gmra.mxu1 %vm146_vm2, %v231_v34  ;;  %226 = vmatmul.msk.bf16.vlgmr.msra.gmra.mxu3 %vm146_vm2, %v232_v35 }
 0x128   :  { %v162_v37 = vpop.f32.mrf.mxu1 }
 0x129   :  { %v163_v48 = vadd.f32 %v162_v37, %v119_v47 }
 0x12e   :  { %v167_v38 = vpop.f32.mrf.mxu3 }
 0x12f   :  { %v168_v42 = vadd.f32 %v167_v38, %v129_v36 }
 0x130   :  { %v164_v40 = vpop.f32.mrf.mxu1 }
 0x131   :  { %v165_v45 = vadd.f32 %v164_v40, %v124_v44 }
 0x133   :  { %v173_v49 = vpack.c.bf16 %v165_v45, %v163_v48 }
 0x136   :  { %v169_v41 = vpop.f32.mrf.mxu3 }
 0x137   :  { %v170_v43 = vadd.f32 %v169_v41, %v134_v39 }
 0x139   :  { %v174_v46 = vpack.c.bf16 %v170_v43, %v168_v42 }
 0x13b   :  { %190 = vmatpush.bf16.msra.mxu2 %v174_v46 }
 0x13f   :  { %191 = vmatpush.bf16.msra.mxu2 %v173_v49 }
 0x142   :  { %227 = vmatmul.msk.bf16.vlgmr.msra.gmra.mxu2 %vm146_vm2, %v172_v50 }
 0x1c5   :  { %v193_v52 = vpop.f32.mrf.mxu2 }
 0x1c6   :  { %v194_v53 = vadd.f32 %v193_v52, %v179_v51 }
 0x1c8   :  { %198 = vst.msk [vmem:[%s341_s7] sm:$0xff] %vm197_vm3, %v194_v53 }
 0x1cd   :  { %v195_v54 = vpop.f32.mrf.mxu2 }

</bundles_post_ra>
